<compile_context>
chip_gen: v7x
topology: tpu7x:2x2x1
jax: 0.10.0
libtpu: 0.0.40
codegen_flags: <defaults>
</compile_context>

<pallas_src>
import functools

import jax
import jax.numpy as jnp
from jax.experimental import pallas as pl
from jax.experimental.pallas import tpu as pltpu


# Conservative budgets so the same tiling is safe on v7x (64 MiB VMEM/TC)
# as well as v5e/v6e (128 MiB).
_FUSED_VMEM_BUDGET = 32 * 1024 * 1024
_VMEM_LIMIT_BYTES = 48 * 1024 * 1024


# --------------------------------------------------------------------------
# Fused path: whole (B, C, HW) feature resident in VMEM.
# One kernel: stats (batch + lane reduce) then normalize; x read once.
# --------------------------------------------------------------------------
def cbn_fused_kernel(x_ref, gamma_ref, beta_ref, out_ref, *, eps, n_total):
    x = x_ref[...].astype(jnp.float32)                    # (B, C, HW)
    s = jnp.sum(x, axis=0)                                # (C, HW)  VPU adds
    sq = jnp.sum(x * x, axis=0)                           # (C, HW)
    ssum = jnp.sum(s, axis=1, keepdims=True)              # (C, 1)   one XLU reduce
    ssq = jnp.sum(sq, axis=1, keepdims=True)              # (C, 1)
    mean = ssum / n_total
    # biased variance; clamp against E[x^2]-mean^2 cancellation
    var = jnp.maximum(ssq / n_total - mean * mean, 0.0)
    inv_std = jax.lax.rsqrt(var + eps)                    # (C, 1)
    scale = gamma_ref[...] * inv_std[None, :, :]          # (B, C, 1)
    shift = beta_ref[...] - mean[None, :, :] * scale      # (B, C, 1)
    out_ref[...] = (x * scale + shift).astype(out_ref.dtype)


# --------------------------------------------------------------------------
# Tiled path, pass 1: per-channel batch statistics.
# Grid over (batch, HW tiles); full-lane-width accumulators in VMEM scratch,
# cross-lane reduce only once in the final step.  Ragged tail is lane-masked.
# --------------------------------------------------------------------------
def bn_stats_kernel(x_ref, mean_ref, var_ref, sum_ref, sumsq_ref, *,
                    n_total, hw, hw_block):
    b = pl.program_id(0)
    s = pl.program_id(1)

    @pl.when(jnp.logical_and(b == 0, s == 0))
    def _():
        sum_ref[...] = jnp.zeros_like(sum_ref)
        sumsq_ref[...] = jnp.zeros_like(sumsq_ref)

    x = x_ref[0].astype(jnp.float32)                      # (C, hw_block)
    if hw % hw_block != 0:
        # mask out-of-range lanes of the last (padded) tile
        lane = jax.lax.broadcasted_iota(jnp.int32, x.shape, 1)
        x = jnp.where(s * hw_block + lane < hw, x, 0.0)
    sum_ref[...] += x                                     # pure VPU in the loop
    sumsq_ref[...] += x * x

    @pl.when(jnp.logical_and(b == pl.num_programs(0) - 1,
                             s == pl.num_programs(1) - 1))
    def _():
        ssum = jnp.sum(sum_ref[...], axis=1, keepdims=True)    # (C, 1)
        ssq = jnp.sum(sumsq_ref[...], axis=1, keepdims=True)   # (C, 1)
        mean = ssum / n_total
        mean_ref[...] = mean
        var_ref[...] = jnp.maximum(ssq / n_total - mean * mean, 0.0)


# --------------------------------------------------------------------------
# Tiled path, pass 2: apply.  scale/shift are precomputed per (b, c), so the
# body is a single FMA; lane dim (HW tile) is a multiple of 128.
# --------------------------------------------------------------------------
def bn_apply_kernel(x_ref, scale_ref, shift_ref, out_ref):
    x = x_ref[...].astype(jnp.float32)                    # (1, C, hw_block)
    out_ref[...] = (x * scale_ref[...] + shift_ref[...]).astype(out_ref.dtype)


def _pick_hw_block(hw, c, target_bytes=2 * 1024 * 1024):
    """Lane-dim tile: multiple of 128, sized for ~target_bytes per x block."""
    full = ((hw + 127) // 128) * 128
    cap = max(128, ((target_bytes // (c * 4)) // 128) * 128)
    return min(full, cap)


# --------------------------------------------------------------------------
# Wrapper
# --------------------------------------------------------------------------
def cbn_forward(feature, brdf_emb, params, eps=1e-5, force_tiled=False):
    B, C, H, W = feature.shape
    HW = H * W
    n_total = float(B * HW)

    # Free view (NCHW is contiguous): H*W goes on the lane dim. No transposes.
    x = feature.reshape(B, C, HW)

    # ---- conditional gamma / beta: tiny MLPs -> plain JAX (XLA fuses) ----
    hg = jnp.maximum(brdf_emb @ params["wg1"] + params["bg1"], 0.0)
    dgamma = hg @ params["wg2"] + params["bg2"]
    hb = jnp.maximum(brdf_emb @ params["wb1"] + params["bb1"], 0.0)
    dbeta = hb @ params["wb2"] + params["bb2"]
    gamma = (params["gammas"] + dgamma).astype(jnp.float32)     # (B, C)
    beta = (params["betas"] + dbeta).astype(jnp.float32)        # (B, C)
    gamma3 = gamma[:, :, None]                                  # (B, C, 1)
    beta3 = beta[:, :, None]                                    # (B, C, 1)

    x_f32_bytes = B * C * HW * 4
    fused_ok = (not force_tiled) and (4 * x_f32_bytes <= _FUSED_VMEM_BUDGET)

    if fused_ok:
        out = pl.pallas_call(
            functools.partial(cbn_fused_kernel, eps=eps, n_total=n_total),
            out_shape=jax.ShapeDtypeStruct((B, C, HW), feature.dtype),
            compiler_params=pltpu.CompilerParams(
                vmem_limit_bytes=_VMEM_LIMIT_BYTES),
        )(x, gamma3, beta3)
    else:
        hw_block = _pick_hw_block(HW, C)
        n_s = pl.cdiv(HW, hw_block)

        mean, var = pl.pallas_call(
            functools.partial(bn_stats_kernel, n_total=n_total,
                              hw=HW, hw_block=hw_block),
            out_shape=(jax.ShapeDtypeStruct((C, 1), jnp.float32),
                       jax.ShapeDtypeStruct((C, 1), jnp.float32)),
            grid_spec=pltpu.PrefetchScalarGridSpec(
                num_scalar_prefetch=0,
                grid=(B, n_s),
                in_specs=[pl.BlockSpec((1, C, hw_block),
                                       lambda b, s: (b, 0, s))],
                out_specs=[pl.BlockSpec((C, 1), lambda b, s: (0, 0)),
                           pl.BlockSpec((C, 1), lambda b, s: (0, 0))],
                scratch_shapes=[pltpu.VMEM((C, hw_block), jnp.float32),
                                pltpu.VMEM((C, hw_block), jnp.float32)],
            ),
            compiler_params=pltpu.CompilerParams(
                dimension_semantics=("arbitrary", "arbitrary"),
                vmem_limit_bytes=_VMEM_LIMIT_BYTES),
        )(x)

        # Fold mean/var/gamma/beta into a single per-(b,c) scale & shift so the
        # apply kernel is a pure FMA (tiny op, cheap in plain JAX).
        inv_std = jax.lax.rsqrt(var + eps)                      # (C, 1)
        scale = gamma3 * inv_std[None, :, :]                    # (B, C, 1)
        shift = beta3 - mean[None, :, :] * scale                # (B, C, 1)

        out = pl.pallas_call(
            bn_apply_kernel,
            out_shape=jax.ShapeDtypeStruct((B, C, HW), feature.dtype),
            grid_spec=pltpu.PrefetchScalarGridSpec(
                num_scalar_prefetch=0,
                grid=(B, n_s),
                in_specs=[pl.BlockSpec((1, C, hw_block),
                                       lambda b, s: (b, 0, s)),
                          pl.BlockSpec((1, C, 1), lambda b, s: (b, 0, 0)),
                          pl.BlockSpec((1, C, 1), lambda b, s: (b, 0, 0))],
                out_specs=pl.BlockSpec((1, C, hw_block),
                                       lambda b, s: (b, 0, s)),
            ),
            compiler_params=pltpu.CompilerParams(
                dimension_semantics=("parallel", "parallel"),
                vmem_limit_bytes=_VMEM_LIMIT_BYTES),
        )(x, scale, shift)

    return out.reshape(B, C, H, W), brdf_emb


# --------------------------------------------------------------------------
# Deterministic parameter init (xavier_uniform weights, bias = 0.1)
# --------------------------------------------------------------------------
def init_params(key, brdf_emb_size, emb_size, channels):
    def xavier(k, fan_in, fan_out):
        limit = jnp.sqrt(6.0 / (fan_in + fan_out))
        return jax.random.uniform(k, (fan_in, fan_out), jnp.float32, -limit, limit)

    k = jax.random.split(key, 4)
    return {
        "wg1": xavier(k[0], brdf_emb_size, emb_size),
        "bg1": jnp.full((1, emb_size), 0.1, jnp.float32),
        "wg2": xavier(k[1], emb_size, channels),
        "bg2": jnp.full((1, channels), 0.1, jnp.float32),
        "wb1": xavier(k[2], brdf_emb_size, emb_size),
        "bb1": jnp.full((1, emb_size), 0.1, jnp.float32),
        "wb2": xavier(k[3], emb_size, channels),
        "bb2": jnp.full((1, channels), 0.1, jnp.float32),
        "betas": jnp.zeros((1, channels), jnp.float32),
        "gammas": jnp.ones((1, channels), jnp.float32),
    }


# --------------------------------------------------------------------------
# Pure-JAX reference (correctness check)
# --------------------------------------------------------------------------
def cbn_reference(feature, brdf_emb, params, eps=1e-5):
    hg = jnp.maximum(brdf_emb @ params["wg1"] + params["bg1"], 0.0)
    dg = hg @ params["wg2"] + params["bg2"]
    hb = jnp.maximum(brdf_emb @ params["wb1"] + params["bb1"], 0.0)
    db = hb @ params["wb2"] + params["bb2"]
    gamma = params["gammas"] + dg
    beta = params["betas"] + db
    mean = feature.mean(axis=(0, 2, 3))
    var = feature.var(axis=(0, 2, 3))  # biased
    fn = (feature - mean[None, :, None, None]) / jnp.sqrt(
        var[None, :, None, None] + eps)
    return fn * gamma[:, :, None, None] + beta[:, :, None, None]


if __name__ == "__main__":
    brdf_emb_size, emb_size = 16, 32
    eps = 1e-5
    key = jax.random.PRNGKey(0)

    cases = [
        ((2, 8, 16, 16), False),   # fused path (whole x resident in VMEM)
        ((2, 8, 16, 16), True),    # tiled path (stats + apply)
        ((2, 8, 10, 10), True),    # tiled path with ragged (non-128) HW
    ]

    for idx, ((B, C, H, W), force_tiled) in enumerate(cases):
        k_feat, k_emb, k_par = jax.random.split(jax.random.fold_in(key, idx), 3)
        feature = jax.random.normal(k_feat, (B, C, H, W), jnp.float32)
        brdf_emb = jax.random.normal(k_emb, (B, brdf_emb_size), jnp.float32)
        params = init_params(k_par, brdf_emb_size, emb_size, C)

        out, emb_back = cbn_forward(feature, brdf_emb, params, eps=eps,
                                    force_tiled=force_tiled)
        out = jax.block_until_ready(out)

        ref = cbn_reference(feature, brdf_emb, params, eps=eps)
        assert out.shape == (B, C, H, W)
        assert jnp.allclose(out, ref, atol=1e-4, rtol=1e-4), \
            f"mismatch vs reference (case {idx})"
        assert jnp.array_equal(emb_back, brdf_emb)

    print("KERNEL_OK")
</pallas_src>

<mosaic_0001>
module attributes {stable_mosaic.version = 11 : i64} {
  func.func @cbn_fused_kernel(%arg0: memref<2x8x256xf32, #tpu.memory_space<vmem>>, %arg1: memref<2x8x1xf32, #tpu.memory_space<vmem>>, %arg2: memref<2x8x1xf32, #tpu.memory_space<vmem>>, %arg3: memref<2x8x256xf32, #tpu.memory_space<vmem>>) attributes {dimension_semantics = [], scalar_prefetch = 0 : i64, scratch_operands = 0 : i64, tpu.core_type = #tpu.core_type<tc>} {
    %c0 = arith.constant 0 : index
    %c0_0 = arith.constant 0 : index
    %c0_1 = arith.constant 0 : index
    %0 = vector.load %arg0[%c0, %c0_0, %c0_1] : memref<2x8x256xf32, #tpu.memory_space<vmem>>, vector<2x8x256xf32>
    %cst = arith.constant dense<0.000000e+00> : vector<8x256xf32>
    %1 = vector.multi_reduction <add>, %0, %cst [0] : vector<2x8x256xf32> to vector<8x256xf32>
    %2 = arith.mulf %0, %0 : vector<2x8x256xf32>
    %cst_2 = arith.constant dense<0.000000e+00> : vector<8x256xf32>
    %3 = vector.multi_reduction <add>, %2, %cst_2 [0] : vector<2x8x256xf32> to vector<8x256xf32>
    %cst_3 = arith.constant dense<0.000000e+00> : vector<8xf32>
    %4 = vector.multi_reduction <add>, %1, %cst_3 [1] : vector<8x256xf32> to vector<8xf32>
    %5 = vector.shape_cast %4 : vector<8xf32> to vector<8x1xf32>
    %cst_4 = arith.constant dense<0.000000e+00> : vector<8xf32>
    %6 = vector.multi_reduction <add>, %3, %cst_4 [1] : vector<8x256xf32> to vector<8xf32>
    %7 = vector.shape_cast %6 : vector<8xf32> to vector<8x1xf32>
    %cst_5 = arith.constant 5.120000e+02 : f32
    %8 = vector.broadcast %cst_5 : f32 to vector<8x1xf32>
    %9 = arith.divf %5, %8 : vector<8x1xf32>
    %cst_6 = arith.constant 5.120000e+02 : f32
    %10 = vector.broadcast %cst_6 : f32 to vector<8x1xf32>
    %11 = arith.divf %7, %10 : vector<8x1xf32>
    %12 = arith.mulf %9, %9 : vector<8x1xf32>
    %13 = arith.subf %11, %12 : vector<8x1xf32>
    %cst_7 = arith.constant 0.000000e+00 : f32
    %14 = vector.broadcast %cst_7 : f32 to vector<8x1xf32>
    %15 = arith.maximumf %13, %14 : vector<8x1xf32>
    %cst_8 = arith.constant 9.99999974E-6 : f32
    %16 = vector.broadcast %cst_8 : f32 to vector<8x1xf32>
    %17 = arith.addf %15, %16 : vector<8x1xf32>
    %18 = math.rsqrt %17 : vector<8x1xf32>
    %c0_9 = arith.constant 0 : index
    %c0_10 = arith.constant 0 : index
    %c0_11 = arith.constant 0 : index
    %19 = vector.load %arg1[%c0_9, %c0_10, %c0_11] : memref<2x8x1xf32, #tpu.memory_space<vmem>>, vector<2x8x1xf32>
    %20 = vector.shape_cast %18 : vector<8x1xf32> to vector<1x8x1xf32>
    %21 = vector.broadcast %20 : vector<1x8x1xf32> to vector<2x8x1xf32>
    %22 = arith.mulf %19, %21 : vector<2x8x1xf32>
    %c0_12 = arith.constant 0 : index
    %c0_13 = arith.constant 0 : index
    %c0_14 = arith.constant 0 : index
    %23 = vector.load %arg2[%c0_12, %c0_13, %c0_14] : memref<2x8x1xf32, #tpu.memory_space<vmem>>, vector<2x8x1xf32>
    %24 = vector.shape_cast %9 : vector<8x1xf32> to vector<1x8x1xf32>
    %25 = vector.broadcast %24 : vector<1x8x1xf32> to vector<2x8x1xf32>
    %26 = arith.mulf %25, %22 : vector<2x8x1xf32>
    %27 = arith.subf %23, %26 : vector<2x8x1xf32>
    %28 = vector.broadcast %22 : vector<2x8x1xf32> to vector<2x8x256xf32>
    %29 = arith.mulf %0, %28 : vector<2x8x256xf32>
    %30 = vector.broadcast %27 : vector<2x8x1xf32> to vector<2x8x256xf32>
    %31 = arith.addf %29, %30 : vector<2x8x256xf32>
    %c0_15 = arith.constant 0 : index
    %c0_16 = arith.constant 0 : index
    %c0_17 = arith.constant 0 : index
    %32 = vector.load %arg3[%c0_15, %c0_16, %c0_17] : memref<2x8x256xf32, #tpu.memory_space<vmem>>, vector<2x8x256xf32>
    tpu.vector_store %arg3[%c0_15, %c0_16, %c0_17], %31 {strides = array<i32>} : memref<2x8x256xf32, #tpu.memory_space<vmem>>, vector<2x8x256xf32>,
    return
  }
}

</mosaic_0001>

<bundles_post_ra>
// kernel: tpu_custom_call.1
= control target key start
LH: loop header
LB: loop body
LE: loop exit
PB: predicated region body
PF: predicated region fallthrough
CT: control target
= control target key end

     0   :  { %s191_s0 = inlined_call_operand.vmem [shape: f32[2,8,256], index: 0, kind: input, shape index: {}]   ;;  %s192_s1 = inlined_call_operand.vmem [shape: f32[2,8,1], index: 1, kind: input, shape index: {}]   ;;  %s193_s2 = inlined_call_operand.vmem [shape: f32[2,8,1], index: 2, kind: input, shape index: {}]   ;;  %s194_s3 = inlined_call_operand.hbm [shape: f32[2,8,256], index: 3, kind: output, shape index: {}]  }
   0x1   :  { %v15_v0 = vld [vmem:[%s191_s0] sm:$0xff]  ;;  %v16_v1 = vld [vmem:[%s191_s0 + $0x8] sm:$0xff]  ;;  %v17_v2 = vld [vmem:[%s191_s0 + $0x10] sm:$0xff] }
   0x2   :  { %v18_v3 = vld [vmem:[%s191_s0 + $0x18] sm:$0xff]  ;;  %v19_v4 = vadd.f32 %v17_v2, %v15_v0  ;;  %v21_v5 = vmul.f32 %v15_v0, %v15_v0  ;;  %v22_v6 = vmul.f32 %v16_v1, %v16_v1  ;;  %v23_v7 = vmul.f32 %v17_v2, %v17_v2 }
   0x3   :  { %8 = vsyncpa [#allocation3], 0  ;;  %v20_v8 = vadd.f32 %v18_v3, %v16_v1  ;;  %v24_v9 = vmul.f32 %v18_v3, %v18_v3  ;;  %v131_v14 = vmov 0   ;;  %v41_v23 = vld [vmem:[%s192_s1] sm:$0xff]  ;;  %v42_v24 = vld [vmem:[%s192_s1 + $0x8] sm:$0xff]  ;;  %s132_s1 = smov [#allocation2]  }
   0x4   :  { %v25_v10 = vadd.f32 %v23_v7, %v21_v5  ;;  %103 = vset.pattern.permute.xlu1 %v131_v14  ;;  %104 = vset.pattern.permute.xlu0 %v131_v14  ;;  %v45_v28 = vld [vmem:[%s193_s2] sm:$0xff]  ;;  %v46_v32 = vld [vmem:[%s193_s2 + $0x8] sm:$0xff]  ;;  %s88_s27 = sshll.u32 %s132_s1, 4  ;;  %s89_s27 = int_to_ptr.vmem [resolvable:$true] %s88_s27 }
   0x5   :  { %v27_v11 = vadd.f32 %v20_v8, %v19_v4  ;;  %v26_v12 = vadd.f32 %v24_v9, %v22_v6  ;;  %s107_s2 = scalar_lea.vmem %s89_s27, 512  ;;  %p112_p1 = scmp.lt.s32.totalorder %s89_s27, %s89_s27 }
   0x6   :  { %p108_p0 = scmp.ne.s32.totalorder %s89_s27, %s107_s2  ;;  %p113_p2 = scmp.lt.s32.totalorder %s107_s2, %s107_s2 }
   0x7   :  { %28 = vadd.xlane.f32.xlu0 %v27_v11  ;;  %v30_v13 = vadd.f32 %v26_v12, %v25_v10 }
   0x8   :  { %p114_p3 = por %p113_p2, %p112_p1 }
   0xa   :  { %p115_p4 = pnand %p114_p3, %p108_p0 }
   0xb   :  { %31 = vadd.xlane.f32.xlu0 %v30_v13 }
  0x94   :  { %v29_v15 = vpop.xlane.xlu0 %28 }
  0x95   :  { %v34_v16 = vmul.f32 0.001953125, %v29_v15 }
  0x97   :  { %v36_v18 = vmul.f32 %v34_v16, %v34_v16 }
  0x98   :  { %v32_v17 = vpop.xlane.xlu0 %31 }
  0x99   :  { %v35_v19 = vmul.f32 0.001953125, %v32_v17 }
  0x9b   :  { %v37_v20 = vsub.f32 %v35_v19, %v36_v18 }
  0x9d   :  { %v38_v21 = vmax.f32 %v37_v20, 0.0 }
  0x9f   :  { %v39_v22 = vadd.f32 1e-05, %v38_v21 }
  0xa1   :  { %105 = vrsqrt.f32 %v39_v22 }
  0xab   :  { %v106_v25 = vpop.eup %105 }
  0xac   :  { %v43_v26 = vmul.f32 %v106_v25, %v41_v23  ;;  %v44_v27 = vmul.f32 %v106_v25, %v42_v24 }
  0xae   :  { %53 = vperm.xlu1 %103, %v43_v26   ;;  %v47_v29 = vmul.f32 %v43_v26, %v34_v16  ;;  %v48_v31 = vmul.f32 %v44_v27, %v34_v16 }
  0xb0   :  { %v49_v30 = vsub.f32 %v45_v28, %v47_v29  ;;  %v50_v33 = vsub.f32 %v46_v32, %v48_v31 }
  0xb2   :  { %58 = vperm.xlu1 %103, %v44_v27   ;;  %67 = vperm.xlu0 %104, %v49_v30  }
  0xb6   :  { %72 = vperm.xlu1 %103, %v50_v33  }
 0x12d   :  { %v54_v34 = vpop.permute.xlu1 %53 }
 0x12e   :  { %v61_v35 = vmul.f32 %v54_v34, %v15_v0  ;;  %v62_v36 = vmul.f32 %v54_v34, %v16_v1 }
 0x131   :  { %v59_v37 = vpop.permute.xlu1 %58  ;;  %v68_v38 = vpop.permute.xlu0 %67 }
 0x132   :  { %v75_v39 = vadd.f32 %v68_v38, %v61_v35  ;;  %v76_v40 = vadd.f32 %v68_v38, %v62_v36  ;;  %v63_v41 = vmul.f32 %v59_v37, %v17_v2  ;;  %v64_v42 = vmul.f32 %v59_v37, %v18_v3 }
 0x134   :  { %79 = vst [vmem:[#allocation2] sm:$0xff] %v75_v39  ;;  %80 = vst [vmem:[#allocation2 + $0x8] sm:$0xff] %v76_v40 }
 0x135   :  { %v73_v43 = vpop.permute.xlu1 %72 }
 0x136   :  { %v77_v44 = vadd.f32 %v73_v43, %v63_v41  ;;  %v78_v45 = vadd.f32 %v73_v43, %v64_v42 }
 0x138   :  { %81 = vst [vmem:[#allocation2 + $0x10] sm:$0xff] %v77_v44  ;;  %82 = vst [vmem:[#allocation2 + $0x18] sm:$0xff] %v78_v45 }
 0x139   :  { %118 = shalt.err (!%p115_p4)
}
 0x13a   :  { %s119_s30 = scalar_lea.hbm %s194_s3, 512 }
 0x13b   :  { %p120_p5 = scmp.ne.s32.totalorder %s194_s3, %s119_s30  ;;  %p123_p6 = scmp.lt.u32.totalorder %s119_s30, %s194_s3 }
 0x13d   :  { %p125_p7 = pnand %p123_p6, %p120_p5 }
 0x13f   :  { %128 = shalt.err (!%p125_p7)
}
 0x140   :  { %s133_s8 = smov 256   ;;  %s134_s9 = smov 16  }
 0x141   :  { %94 = dma.vmem_to_hbm [thread:$0]  %s89_s27, 512, %s194_s3, [#allocation3], %s133_s8, %s133_s8, %s134_s9  }
 0x142   :  { %129 = dma.done.wait [#allocation3], 512  }
 0x143   :  { %130 = vsyncadd [#allocation3], 4294966784 }
 0x144   :  { %98 = vsyncpa [#allocation3], 1 }

</bundles_post_ra>
